<compile_context>
chip_gen: v5e
topology: v5e:2x2
jax: 0.10.0
libtpu: 0.0.40
codegen_flags: <defaults>
</compile_context>

<pallas_src>
import jax
import jax.numpy as jnp
from jax.experimental import pallas as pl
from jax.experimental.pallas import tpu as pltpu

HIDDEN = 256                          # first linear width (matches the PyTorch module)
_TK_MAX = 2048                        # max reduction tile over D (fallback path only)
_TB_CANDIDATES = (512, 256, 128, 64, 32, 16)
_VMEM_BUDGET = 40 * 1024 * 1024       # working-set budget (v7x: 64 MiB physical VMEM)
_VMEM_LIMIT = 48 * 1024 * 1024        # scoped VMEM limit passed to Mosaic
_W1_RESIDENT_MAX = 12 * 1024 * 1024   # keep w1 fully VMEM-resident up to this size


def _round_up(x, m):
    return (x + m - 1) // m * m


def _plan(d):
    """Tiling plan shared by prepare_params and discriminator_forward.

    Returns (Dp, TK, TB, single):
      Dp     padded feature dim (round_up(D,128) on the single-K path;
             at most (nk-1)*128 extra on the K-tiled fallback)
      TK     reduction tile
      TB     batch tile upper bound (wrapper may shrink for small batches)
      single True  -> 1-D grid over batch, w1 fully VMEM-resident, no scratch
             False -> 2-D grid (batch, K) with f32 accumulator scratch
    """
    dp = _round_up(d, 128)
    w1_bytes = dp * HIDDEN * 4                        # conservative (f32 path)
    single = w1_bytes <= _W1_RESIDENT_MAX
    if single:
        tk = dp
        resident = w1_bytes                           # w1, single-buffered
        acc_per_row = 0
    else:
        nk = -(-dp // _TK_MAX)                        # ceil
        tk = _round_up(-(-dp // nk), 128)
        dp = nk * tk                                  # pads by at most (nk-1)*128
        resident = 2 * tk * HIDDEN * 4                # double-buffered w1 K slab
        acc_per_row = HIDDEN * 4                      # f32 accumulator scratch

    tb = 16
    for cand in _TB_CANDIDATES:
        x_bytes = 2 * cand * tk * 4                   # double-buffered f32 x tile
        if resident + x_bytes + cand * acc_per_row + cand * 8 <= _VMEM_BUDGET:
            tb = cand
            break
    return dp, tk, tb, single


def _disc_kernel_resident(x_ref, w1_ref, b1_ref, w2_ref, b2_ref, o_ref):
    """Single-K path: whole reduction dim in one MXU call, w1 VMEM-resident.

    x_ref: (TB, Dp) f32    w1_ref: (Dp, H1) bf16/f32
    b1_ref/w2_ref: (1, H1) f32    b2_ref: (1,) f32 SMEM    o_ref: (TB, 1) f32
    """
    w1 = w1_ref[...]
    # In-kernel cast of the x tile to the compute dtype (VPU work, hidden under
    # the x DMA); f32 accumulation on the MXU.
    h = jnp.dot(x_ref[...].astype(w1.dtype), w1, preferred_element_type=jnp.float32)
    h = jnp.maximum(h + b1_ref[...], 0.0)                          # bias + ReLU (f32)
    # Second linear (N=1): VPU multiply + cross-lane (XLU) sum, b2 from SMEM.
    logits = jnp.sum(h * w2_ref[...], axis=-1, keepdims=True) + b2_ref[0]
    o_ref[...] = jax.nn.sigmoid(logits)                            # Sigmoid (f32)


def _disc_kernel_ktiled(x_ref, w1_ref, b1_ref, w2_ref, b2_ref, o_ref, acc_ref):
    """Fallback for very large D: K-tiled MXU matmul with f32 accumulator."""
    k = pl.program_id(1)

    @pl.when(k == 0)
    def _init():
        acc_ref[...] = jnp.zeros_like(acc_ref)

    w1 = w1_ref[...]
    acc_ref[...] += jnp.dot(x_ref[...].astype(w1.dtype), w1,
                            preferred_element_type=jnp.float32)

    @pl.when(k == pl.num_programs(1) - 1)
    def _finalize():
        h = jnp.maximum(acc_ref[...] + b1_ref[...], 0.0)
        logits = jnp.sum(h * w2_ref[...], axis=-1, keepdims=True) + b2_ref[0]
        o_ref[...] = jax.nn.sigmoid(logits)


def prepare_params(w1, b1, w2, b2, compute_dtype=jnp.bfloat16):
    """One-time parameter prep (hoisted out of the per-call path):
    transpose w1 -> (D, H1), pad D only to the 128-lane multiple required by
    the plan, cast the big matmul operand to `compute_dtype`; biases and the
    second-layer row stay f32."""
    hidden, d = w1.shape
    dp, _, _, _ = _plan(d)
    w1_t = w1.T.astype(compute_dtype)                        # (D, H1)
    if dp != d:
        w1_t = jnp.pad(w1_t, ((0, dp - d), (0, 0)))          # zero rows: no effect
    b1_r = b1.reshape(1, hidden).astype(jnp.float32)
    w2_r = w2.reshape(1, hidden).astype(jnp.float32)
    b2_r = b2.reshape(1).astype(jnp.float32)
    return w1_t, b1_r, w2_r, b2_r


def discriminator_forward(x_nchw, params):
    """x_nchw: (B, C, H, W). Returns (B, 1) f32 probabilities."""
    w1_t, b1_r, w2_r, b2_r = params
    B = x_nchw.shape[0]
    x = x_nchw.reshape(B, -1)                 # Flatten (glue; NO dtype cast here)
    D = x.shape[1]
    H1 = w1_t.shape[1]

    Dp, TK, TB, single = _plan(D)
    assert w1_t.shape[0] == Dp, "params were prepared for a different input size"

    # Batch tile: cap at the padded batch; for modest batches, shrink so the
    # "parallel" axis still has >= 2 steps (keeps v7x's second TC busy).
    TB = min(TB, _round_up(B, 16))
    while TB > 16 and _round_up(B, TB) // TB < 2:
        TB //= 2
    Bp = _round_up(B, TB)

    if Bp != B or Dp != D:
        x = jnp.pad(x, ((0, Bp - B), (0, Dp - D)))   # zeros: no effect on the matmul

    # TODO(synk): output last dim is 1 (masked vst); a lane-dense (1, TB) layout
    # is possible but not worth the extra transpose at B*4 output bytes.

    if single:
        out = pl.pallas_call(
            _disc_kernel_resident,
            out_shape=jax.ShapeDtypeStruct((Bp, 1), jnp.float32),
            grid_spec=pltpu.PrefetchScalarGridSpec(
                num_scalar_prefetch=0,
                grid=(Bp // TB,),
                in_specs=[
                    pl.BlockSpec((TB, Dp), lambda i: (i, 0)),        # x batch tile
                    pl.BlockSpec((Dp, H1), lambda i: (0, 0)),        # w1 (VMEM-resident)
                    pl.BlockSpec((1, H1), lambda i: (0, 0)),         # b1 (resident)
                    pl.BlockSpec((1, H1), lambda i: (0, 0)),         # w2 row (resident)
                    pl.BlockSpec(memory_space=pltpu.MemorySpace.SMEM),  # b2 scalar
                ],
                out_specs=pl.BlockSpec((TB, 1), lambda i: (i, 0)),
            ),
            compiler_params=pltpu.CompilerParams(
                dimension_semantics=("parallel",),
                vmem_limit_bytes=_VMEM_LIMIT,
            ),
        )(x, w1_t, b1_r, w2_r, b2_r)
    else:
        out = pl.pallas_call(
            _disc_kernel_ktiled,
            out_shape=jax.ShapeDtypeStruct((Bp, 1), jnp.float32),
            grid_spec=pltpu.PrefetchScalarGridSpec(
                num_scalar_prefetch=0,
                grid=(Bp // TB, Dp // TK),                # reduction axis last
                in_specs=[
                    pl.BlockSpec((TB, TK), lambda i, k: (i, k)),     # x tile
                    pl.BlockSpec((TK, H1), lambda i, k: (k, 0)),     # w1 K slab
                    pl.BlockSpec((1, H1), lambda i, k: (0, 0)),      # b1 (resident)
                    pl.BlockSpec((1, H1), lambda i, k: (0, 0)),      # w2 row (resident)
                    pl.BlockSpec(memory_space=pltpu.MemorySpace.SMEM),
                ],
                out_specs=pl.BlockSpec((TB, 1), lambda i, k: (i, 0)),
                scratch_shapes=[pltpu.VMEM((TB, H1), jnp.float32)],  # f32 accumulator
            ),
            compiler_params=pltpu.CompilerParams(
                dimension_semantics=("parallel", "arbitrary"),
                vmem_limit_bytes=_VMEM_LIMIT,
            ),
        )(x, w1_t, b1_r, w2_r, b2_r)

    return out[:B]                                    # drop padded batch rows


def init_params(key, in_features, hidden=HIDDEN):
    """Deterministic PyTorch-Linear-style init: U(-1/sqrt(fan_in), 1/sqrt(fan_in))."""
    k1, k2, k3, k4 = jax.random.split(key, 4)
    bound1 = 1.0 / jnp.sqrt(in_features)
    bound2 = 1.0 / jnp.sqrt(hidden)
    w1 = jax.random.uniform(k1, (hidden, in_features), jnp.float32, -bound1, bound1)
    b1 = jax.random.uniform(k2, (hidden,), jnp.float32, -bound1, bound1)
    w2 = jax.random.uniform(k3, (1, hidden), jnp.float32, -bound2, bound2)
    b2 = jax.random.uniform(k4, (1,), jnp.float32, -bound2, bound2)
    return w1, b1, w2, b2


if __name__ == "__main__":
    # Small shapes consistent with the module: opt.channels=1, opt.img_size=16
    B, C, H, W = 2, 1, 16, 16
    D = C * H * W  # 256

    key = jax.random.PRNGKey(0)
    kx, kp = jax.random.split(key)
    x = jax.random.normal(kx, (B, C, H, W), jnp.float32)
    w1, b1, w2, b2 = init_params(kp, D, hidden=HIDDEN)

    # Pure-JAX reference.
    ref = jax.nn.sigmoid(
        jnp.maximum(x.reshape(B, -1) @ w1.T + b1, 0.0) @ w2.T + b2
    )

    # f32 compute path (tight check).
    params_f32 = prepare_params(w1, b1, w2, b2, compute_dtype=jnp.float32)
    out_f32 = jax.block_until_ready(discriminator_forward(x, params_f32))
    assert out_f32.shape == (B, 1)
    assert jnp.allclose(out_f32, ref, atol=2e-3, rtol=2e-3), "f32 path mismatch"

    # bf16 matmul operands (default fast path), f32 accumulation / epilogue.
    params_bf16 = prepare_params(w1, b1, w2, b2, compute_dtype=jnp.bfloat16)
    out_bf16 = jax.block_until_ready(discriminator_forward(x, params_bf16))
    assert out_bf16.shape == (B, 1)
    assert jnp.allclose(out_bf16, ref, atol=5e-2, rtol=5e-2), "bf16 path mismatch"

    print("KERNEL_OK")
</pallas_src>

<mosaic_0001>
module attributes {stable_mosaic.version = 11 : i64} {
  func.func @_disc_kernel_resident(%arg0: i32, %arg1: memref<16x256xf32, #tpu.memory_space<vmem>>, %arg2: memref<256x256xf32, #tpu.memory_space<vmem>>, %arg3: memref<1x256xf32, #tpu.memory_space<vmem>>, %arg4: memref<1x256xf32, #tpu.memory_space<vmem>>, %arg5: memref<1xf32, #tpu.memory_space<smem>>, %arg6: memref<16x1xf32, #tpu.memory_space<vmem>>) attributes {dimension_semantics = [#tpu.dimension_semantics<parallel>], iteration_bounds = array<i64: 1>, scalar_prefetch = 0 : i64, scratch_operands = 0 : i64, tpu.core_type = #tpu.core_type<tc>, window_params = [{transform_indices = @transform_0, window_bounds = array<i64: 16, 256>}, {pipeline_mode = #tpu.pipeline_mode<synchronous>, transform_indices = @transform_1, window_bounds = array<i64: 256, 256>}, {pipeline_mode = #tpu.pipeline_mode<synchronous>, transform_indices = @transform_2, window_bounds = array<i64: 1, 256>}, {pipeline_mode = #tpu.pipeline_mode<synchronous>, transform_indices = @transform_3, window_bounds = array<i64: 1, 256>}, {transform_indices = @transform_4, window_bounds = array<i64: 1>}, {transform_indices = @transform_5, window_bounds = array<i64: 16, 1>}]} {
    %c0 = arith.constant 0 : index
    %c0_0 = arith.constant 0 : index
    %0 = vector.load %arg2[%c0, %c0_0] : memref<256x256xf32, #tpu.memory_space<vmem>>, vector<256x256xf32>
    %c0_1 = arith.constant 0 : index
    %c0_2 = arith.constant 0 : index
    %1 = vector.load %arg1[%c0_1, %c0_2] : memref<16x256xf32, #tpu.memory_space<vmem>>, vector<16x256xf32>
    %cst = arith.constant dense<0.000000e+00> : vector<16x256xf32>
    %2 = tpu.matmul %1, %0, %cst {dimension_numbers = #tpu.dot_dimension_numbers<[1], [0], [0], [1], [0, 0, 1, 1], [], []>} : vector<16x256xf32>, vector<256x256xf32>, vector<16x256xf32> -> vector<16x256xf32>
    %c0_3 = arith.constant 0 : index
    %c0_4 = arith.constant 0 : index
    %3 = vector.load %arg3[%c0_3, %c0_4] : memref<1x256xf32, #tpu.memory_space<vmem>>, vector<1x256xf32>
    %4 = vector.broadcast %3 : vector<1x256xf32> to vector<16x256xf32>
    %5 = arith.addf %2, %4 : vector<16x256xf32>
    %cst_5 = arith.constant 0.000000e+00 : f32
    %6 = vector.broadcast %cst_5 : f32 to vector<16x256xf32>
    %7 = arith.maximumf %5, %6 : vector<16x256xf32>
    %c0_6 = arith.constant 0 : index
    %c0_7 = arith.constant 0 : index
    %8 = vector.load %arg4[%c0_6, %c0_7] : memref<1x256xf32, #tpu.memory_space<vmem>>, vector<1x256xf32>
    %9 = vector.broadcast %8 : vector<1x256xf32> to vector<16x256xf32>
    %10 = arith.mulf %7, %9 : vector<16x256xf32>
    %cst_8 = arith.constant dense<0.000000e+00> : vector<16xf32>
    %11 = vector.multi_reduction <add>, %10, %cst_8 [1] : vector<16x256xf32> to vector<16xf32>
    %12 = vector.shape_cast %11 : vector<16xf32> to vector<16x1xf32>
    %c0_9 = arith.constant 0 : index
    %13 = memref.load %arg5[%c0_9] : memref<1xf32, #tpu.memory_space<smem>>
    %14 = vector.broadcast %13 : f32 to vector<16x1xf32>
    %15 = arith.addf %12, %14 : vector<16x1xf32>
    %16 = arith.negf %15 : vector<16x1xf32>
    %17 = math.exp %16 : vector<16x1xf32>
    %cst_10 = arith.constant 1.000000e+00 : f32
    %18 = vector.broadcast %cst_10 : f32 to vector<16x1xf32>
    %19 = arith.addf %18, %17 : vector<16x1xf32>
    %20 = arith.divf %18, %19 : vector<16x1xf32>
    %c0_11 = arith.constant 0 : index
    %c0_12 = arith.constant 0 : index
    %21 = vector.load %arg6[%c0_11, %c0_12] : memref<16x1xf32, #tpu.memory_space<vmem>>, vector<16x1xf32>
    tpu.vector_store %arg6[%c0_11, %c0_12], %20 {strides = array<i32>} : memref<16x1xf32, #tpu.memory_space<vmem>>, vector<16x1xf32>,
    return
  }
  func.func @transform_0(%arg0: i32) -> (i32, i32) {
    %c0_i32 = arith.constant 0 : i32
    %c0_i32_0 = arith.constant 0 : i32
    return %arg0, %c0_i32 : i32, i32
  }
  func.func @transform_1(%arg0: i32) -> (i32, i32) {
    %c0_i32 = arith.constant 0 : i32
    %c0_i32_0 = arith.constant 0 : i32
    %c0_i32_1 = arith.constant 0 : i32
    return %c0_i32, %c0_i32_0 : i32, i32
  }
  func.func @transform_2(%arg0: i32) -> (i32, i32) {
    %c0_i32 = arith.constant 0 : i32
    %c0_i32_0 = arith.constant 0 : i32
    %c0_i32_1 = arith.constant 0 : i32
    return %c0_i32, %c0_i32_0 : i32, i32
  }
  func.func @transform_3(%arg0: i32) -> (i32, i32) {
    %c0_i32 = arith.constant 0 : i32
    %c0_i32_0 = arith.constant 0 : i32
    %c0_i32_1 = arith.constant 0 : i32
    return %c0_i32, %c0_i32_0 : i32, i32
  }
  func.func @transform_4(%arg0: i32) -> i32 {
    %c0_i32 = arith.constant 0 : i32
    %c0_i32_0 = arith.constant 0 : i32
    return %c0_i32 : i32
  }
  func.func @transform_5(%arg0: i32) -> (i32, i32) {
    %c0_i32 = arith.constant 0 : i32
    %c0_i32_0 = arith.constant 0 : i32
    return %arg0, %c0_i32 : i32, i32
  }
}

</mosaic_0001>

<bundles_post_ra>
// kernel: tpu_custom_call.1
= control target key start
LH: loop header
LB: loop body
LE: loop exit
PB: predicated region body
PF: predicated region fallthrough
CT: control target
= control target key end

     0   :  { %11 = vsyncpa [#allocation4], 0  ;;  %s413_s0 = inlined_call_operand.hbm [shape: f32[16,256], index: 0, kind: input, shape index: {}]   ;;  %s414_s1 = inlined_call_operand.hbm [shape: f32[256,256], index: 1, kind: input, shape index: {}]   ;;  %s415_s2 = inlined_call_operand.vmem [shape: f32[1,256], index: 2, kind: input, shape index: {}]   ;;  %s416_s3 = inlined_call_operand.vmem [shape: f32[1,256], index: 3, kind: input, shape index: {}]   ;;  %s417_s4 = inlined_call_operand.<no memory space> [shape: f32[1], index: 4, kind: input, shape index: {}]   ;;  %s418_s5 = inlined_call_operand.vmem [shape: f32[16,1], index: 5, kind: output, shape index: {}]  }
   0x1   :  { %s17_s20 = sshll.u32 %s413_s0, 4  ;;  %s18_s20 = int_to_ptr.hbm [resolvable:$true] %s17_s20 }
   0x2   :  { %12 = vsyncpa [#allocation6], 0  ;;  %s356_s21 = smov [#allocation3]   ;;  %s30_s25 = sshll.u32 %s414_s1, 4  ;;  %s31_s25 = int_to_ptr.hbm [resolvable:$true] %s30_s25 }
   0x3   :  { %s19_s22 = sshll.u32 %s356_s21, 4  ;;  %s357_s26 = smov 256   ;;  %s20_s22 = int_to_ptr.vmem [resolvable:$true] %s19_s22 }
   0x4   :  { %s358_s27 = smov 16   ;;  %s359_s28 = smov [#allocation5]  }
   0x5   :  { %25 = dma.hbm_to_vmem [thread:$0]  %s18_s20, 512, %s20_s22, [#allocation4], %s357_s26, %s357_s26, %s358_s27  }
   0x6   :  { %s32_s29 = sshll.u32 %s359_s28, 4  ;;  %s33_s29 = int_to_ptr.vmem [resolvable:$true] %s32_s29 }
   0x7   :  { %38 = dma.hbm_to_vmem [thread:$0]  %s31_s25, 8192, %s33_s29, [#allocation6], %s357_s26, %s357_s26, %s358_s27  }
   0x8   :  { %352 = dma.done.wait [#allocation4], 512  }
   0x9   :  { %353 = vsyncadd [#allocation4], 4294966784 }
   0xa   :  { %354 = dma.done.wait [#allocation6], 8192  }
   0xb   :  { %355 = vsyncadd [#allocation6], 4294959104  ;;  %v84_v0 = vld [vmem:[#allocation5 + $0xf8] sm:$0xff]  ;;  %v82_v1 = vld [vmem:[#allocation5 + $0xe8] sm:$0xff]  ;;  %vm281_vm2 = vcmask 7168  }
   0xc   :  { %v116_v2 = vld [vmem:[#allocation5 + $0x1f8] sm:$0xff]  ;;  %173 = vmatpush.msra.mxu2 %v84_v0  ;;  %v114_v3 = vld [vmem:[#allocation5 + $0x1e8] sm:$0xff]  ;;  %v83_v4 = vld [vmem:[#allocation5 + $0xf0] sm:$0xff] }
   0xd   :  { %196 = vmatpush.msra.mxu3 %v116_v2  ;;  %v80_v5 = vld [vmem:[#allocation5 + $0xd8] sm:$0xff]  ;;  %127 = vmatpush.msra.mxu0 %v83_v4  ;;  %v81_v7 = vld [vmem:[#allocation5 + $0xe0] sm:$0xff]  ;;  %v78_v8 = vld [vmem:[#allocation5 + $0xc8] sm:$0xff] }
   0xe   :  { %v112_v6 = vld [vmem:[#allocation5 + $0x1d8] sm:$0xff]  ;;  %174 = vmatpush.msra.mxu2 %v82_v1  ;;  %v115_v9 = vld [vmem:[#allocation5 + $0x1f0] sm:$0xff]  ;;  %v110_v10 = vld [vmem:[#allocation5 + $0x1c8] sm:$0xff] }
   0xf   :  { %197 = vmatpush.msra.mxu3 %v114_v3  ;;  %128 = vmatpush.msra.mxu0 %v81_v7  ;;  %v79_v11 = vld [vmem:[#allocation5 + $0xd0] sm:$0xff]  ;;  %v113_v12 = vld [vmem:[#allocation5 + $0x1e0] sm:$0xff]  ;;  %v76_v15 = vld [vmem:[#allocation5 + $0xb8] sm:$0xff] }
  0x10   :  { %150 = vmatpush.msra.mxu1 %v115_v9  ;;  %175 = vmatpush.msra.mxu2 %v80_v5  ;;  %v77_v13 = vld [vmem:[#allocation5 + $0xc0] sm:$0xff]  ;;  %v111_v14 = vld [vmem:[#allocation5 + $0x1d0] sm:$0xff]  ;;  %v108_v16 = vld [vmem:[#allocation5 + $0x1b8] sm:$0xff] }
  0x11   :  { %198 = vmatpush.msra.mxu3 %v112_v6  ;;  %129 = vmatpush.msra.mxu0 %v79_v11  ;;  %v75_v17 = vld [vmem:[#allocation5 + $0xb0] sm:$0xff]  ;;  %v109_v18 = vld [vmem:[#allocation5 + $0x1c0] sm:$0xff]  ;;  %v74_v19 = vld [vmem:[#allocation5 + $0xa8] sm:$0xff] }
  0x12   :  { %151 = vmatpush.msra.mxu1 %v113_v12  ;;  %176 = vmatpush.msra.mxu2 %v78_v8  ;;  %v106_v20 = vld [vmem:[#allocation5 + $0x1a8] sm:$0xff]  ;;  %v73_v21 = vld [vmem:[#allocation5 + $0xa0] sm:$0xff]  ;;  %v107_v22 = vld [vmem:[#allocation5 + $0x1b0] sm:$0xff] }
  0x13   :  { %199 = vmatpush.msra.mxu3 %v110_v10  ;;  %130 = vmatpush.msra.mxu0 %v77_v13  ;;  %v72_v23 = vld [vmem:[#allocation5 + $0x98] sm:$0xff]  ;;  %v71_v25 = vld [vmem:[#allocation5 + $0x90] sm:$0xff]  ;;  %v105_v26 = vld [vmem:[#allocation5 + $0x1a0] sm:$0xff] }
  0x14   :  { %152 = vmatpush.msra.mxu1 %v111_v14  ;;  %177 = vmatpush.msra.mxu2 %v76_v15  ;;  %v104_v24 = vld [vmem:[#allocation5 + $0x198] sm:$0xff]  ;;  %v70_v27 = vld [vmem:[#allocation5 + $0x88] sm:$0xff]  ;;  %v69_v29 = vld [vmem:[#allocation5 + $0x80] sm:$0xff] }
  0x15   :  { %200 = vmatpush.msra.mxu3 %v108_v16  ;;  %131 = vmatpush.msra.mxu0 %v75_v17  ;;  %v102_v28 = vld [vmem:[#allocation5 + $0x188] sm:$0xff]  ;;  %v103_v30 = vld [vmem:[#allocation5 + $0x190] sm:$0xff]  ;;  %v68_v31 = vld [vmem:[#allocation5 + $0x78] sm:$0xff] }
  0x16   :  { %153 = vmatpush.msra.mxu1 %v109_v18  ;;  %178 = vmatpush.msra.mxu2 %v74_v19  ;;  %v100_v32 = vld [vmem:[#allocation5 + $0x178] sm:$0xff]  ;;  %v67_v33 = vld [vmem:[#allocation5 + $0x70] sm:$0xff]  ;;  %v101_v34 = vld [vmem:[#allocation5 + $0x180] sm:$0xff] }
  0x17   :  { %201 = vmatpush.msra.mxu3 %v106_v20  ;;  %132 = vmatpush.msra.mxu0 %v73_v21  ;;  %v66_v35 = vld [vmem:[#allocation5 + $0x68] sm:$0xff]  ;;  %v65_v37 = vld [vmem:[#allocation5 + $0x60] sm:$0xff]  ;;  %v99_v38 = vld [vmem:[#allocation5 + $0x170] sm:$0xff] }
  0x18   :  { %154 = vmatpush.msra.mxu1 %v107_v22  ;;  %179 = vmatpush.msra.mxu2 %v72_v23  ;;  %v98_v36 = vld [vmem:[#allocation5 + $0x168] sm:$0xff]  ;;  %v64_v39 = vld [vmem:[#allocation5 + $0x58] sm:$0xff]  ;;  %v63_v41 = vld [vmem:[#allocation5 + $0x50] sm:$0xff] }
  0x19   :  { %202 = vmatpush.msra.mxu3 %v104_v24  ;;  %133 = vmatpush.msra.mxu0 %v71_v25  ;;  %v96_v40 = vld [vmem:[#allocation5 + $0x158] sm:$0xff]  ;;  %v97_v42 = vld [vmem:[#allocation5 + $0x160] sm:$0xff]  ;;  %v62_v43 = vld [vmem:[#allocation5 + $0x48] sm:$0xff] }
  0x1a   :  { %155 = vmatpush.msra.mxu1 %v105_v26  ;;  %180 = vmatpush.msra.mxu2 %v70_v27  ;;  %v94_v44 = vld [vmem:[#allocation5 + $0x148] sm:$0xff]  ;;  %v61_v45 = vld [vmem:[#allocation5 + $0x40] sm:$0xff]  ;;  %v95_v46 = vld [vmem:[#allocation5 + $0x150] sm:$0xff] }
  0x1b   :  { %203 = vmatpush.msra.mxu3 %v102_v28  ;;  %134 = vmatpush.msra.mxu0 %v69_v29  ;;  %v60_v47 = vld [vmem:[#allocation5 + $0x38] sm:$0xff]  ;;  %v59_v49 = vld [vmem:[#allocation5 + $0x30] sm:$0xff]  ;;  %v93_v50 = vld [vmem:[#allocation5 + $0x140] sm:$0xff] }
  0x1c   :  { %156 = vmatpush.msra.mxu1 %v103_v30  ;;  %181 = vmatpush.msra.mxu2 %v68_v31  ;;  %v92_v48 = vld [vmem:[#allocation5 + $0x138] sm:$0xff]  ;;  %v58_v51 = vld [vmem:[#allocation5 + $0x28] sm:$0xff]  ;;  %v57_v53 = vld [vmem:[#allocation5 + $0x20] sm:$0xff] }
  0x1d   :  { %204 = vmatpush.msra.mxu3 %v100_v32  ;;  %135 = vmatpush.msra.mxu0 %v67_v33  ;;  %v90_v52 = vld [vmem:[#allocation5 + $0x128] sm:$0xff]  ;;  %v91_v54 = vld [vmem:[#allocation5 + $0x130] sm:$0xff]  ;;  %v56_v55 = vld [vmem:[#allocation5 + $0x18] sm:$0xff] }
  0x1e   :  { %157 = vmatpush.msra.mxu1 %v101_v34  ;;  %182 = vmatpush.msra.mxu2 %v66_v35  ;;  %v88_v56 = vld [vmem:[#allocation5 + $0x118] sm:$0xff]  ;;  %v55_v57 = vld [vmem:[#allocation5 + $0x10] sm:$0xff]  ;;  %v89_v58 = vld [vmem:[#allocation5 + $0x120] sm:$0xff] }
  0x1f   :  { %205 = vmatpush.msra.mxu3 %v98_v36  ;;  %136 = vmatpush.msra.mxu0 %v65_v37  ;;  %v54_v59 = vld [vmem:[#allocation5 + $0x8] sm:$0xff]  ;;  %v117_v61 = vld [vmem:[#allocation3] sm:$0xff]  ;;  %v87_v0 = vld [vmem:[#allocation5 + $0x110] sm:$0xff]  ;;  %v240_v36 = vstv %s417_s4 }
  0x20   :  { %158 = vmatpush.msra.mxu1 %v99_v38  ;;  %183 = vmatpush.msra.mxu2 %v64_v39  ;;  %v86_v60 = vld [vmem:[#allocation5 + $0x108] sm:$0xff]  ;;  %v53_v63 = vld [vmem:[#allocation5] sm:$0xff]  ;;  %v119_v2 = vld [vmem:[#allocation3 + $0x10] sm:$0xff] }
  0x21   :  { %206 = vmatpush.msra.mxu3 %v96_v40  ;;  %137 = vmatpush.msra.mxu0 %v63_v41  ;;  %v118_v62 = vld [vmem:[#allocation3 + $0x8] sm:$0xff]  ;;  %v85_v1 = vld [vmem:[#allocation5 + $0x100] sm:$0xff]  ;;  %v120_v3 = vld [vmem:[#allocation3 + $0x18] sm:$0xff] }
  0x22   :  { %159 = vmatpush.msra.mxu1 %v97_v42  ;;  %184 = vmatpush.msra.mxu2 %v62_v43  ;;  %v121_v4 = vld [vmem:[%s415_s2] sm:$0x3] }
  0x23   :  { %207 = vmatpush.msra.mxu3 %v94_v44  ;;  %138 = vmatpush.msra.mxu0 %v61_v45  ;;  %v123_v5 = vperm.slane %v121_v4, 0  ;;  %v124_v8 = vperm.slane %v121_v4, 1  ;;  %v223_v10 = vld [vmem:[%s416_s3] sm:$0x3] }
  0x24   :  { %160 = vmatpush.msra.mxu1 %v95_v46  ;;  %185 = vmatpush.msra.mxu2 %v60_v47  ;;  %v225_v16 = vperm.slane %v223_v10, 0  ;;  %v226_v18 = vperm.slane %v223_v10, 1 }
  0x25   :  { %208 = vmatpush.msra.mxu3 %v92_v48  ;;  %139 = vmatpush.msra.mxu0 %v59_v49 }
  0x26   :  { %161 = vmatpush.msra.mxu1 %v93_v50  ;;  %186 = vmatpush.msra.mxu2 %v58_v51 }
  0x27   :  { %209 = vmatpush.msra.mxu3 %v90_v52  ;;  %140 = vmatpush.msra.mxu0 %v57_v53 }
  0x28   :  { %162 = vmatpush.msra.mxu1 %v91_v54  ;;  %187 = vmatpush.msra.mxu2 %v56_v55 }
  0x29   :  { %210 = vmatpush.msra.mxu3 %v88_v56  ;;  %141 = vmatpush.msra.mxu0 %v55_v57 }
  0x2a   :  { %163 = vmatpush.msra.mxu1 %v89_v58  ;;  %188 = vmatpush.msra.mxu2 %v54_v59 }
  0x2b   :  { %211 = vmatpush.msra.mxu3 %v86_v60  ;;  %189 = vmatmul.f32.vlgmr.msra.gmra.mxu2 %v117_v61 }
  0x2c   :  { %212 = vmatmul.f32.vlgmr.msra.gmra.mxu3 %v118_v62  ;;  %142 = vmatpush.msra.mxu0 %v53_v63 }
  0x2d   :  { %164 = vmatpush.msra.mxu1 %v87_v0  ;;  %143 = vmatmul.f32.vlgmr.msra.gmra.mxu0 %v117_v61 }
  0x2f   :  { %165 = vmatpush.msra.mxu1 %v85_v1 }
  0x30   :  { %166 = vmatmul.f32.vlgmr.msra.gmra.mxu1 %v118_v62 }
  0x33   :  { %192 = vmatmul.f32.gmra.mxu2 %v119_v2 }
  0x34   :  { %215 = vmatmul.f32.gmra.mxu3 %v120_v3 }
  0x35   :  { %146 = vmatmul.f32.gmra.mxu0 %v119_v2 }
  0x38   :  { %169 = vmatmul.f32.gmra.mxu1 %v120_v3 }
  0xaa   :  { %v144_v6 = vpop.f32.mrf.mxu0 }
  0xab   :  { %v145_v7 = vadd.f32 %v144_v6, %v123_v5 }
  0xad   :  { %v167_v9 = vpop.f32.mrf.mxu1 }
  0xae   :  { %v168_v11 = vadd.f32 %v167_v9, %v145_v7  ;;  %v190_v12 = vpop.f32.mrf.mxu2 }
  0xaf   :  { %v213_v13 = vpop.f32.mrf.mxu3  ;;  %v191_v14 = vadd.f32 %v190_v12, %v124_v8 }
  0xb0   :  { %v219_v15 = vmax.f32 %v168_v11, 0.0 }
  0xb1   :  { %v214_v17 = vadd.f32 %v213_v13, %v191_v14 }
  0xb2   :  { %v147_v19 = vpop.f32.mrf.mxu0  ;;  %v229_v22 = vmul.f32 %v225_v16, %v219_v15 }
  0xb3   :  { %v220_v20 = vmax.f32 %v214_v17, 0.0  ;;  %v148_v21 = vadd.f32 %v147_v19, %v123_v5 }
  0xb5   :  { %v170_v23 = vpop.f32.mrf.mxu1  ;;  %v230_v25 = vmul.f32 %v226_v18, %v220_v20 }
  0xb6   :  { %v171_v24 = vadd.f32 %v170_v23, %v148_v21  ;;  %v193_v26 = vpop.f32.mrf.mxu2 }
  0xb7   :  { %v216_v27 = vpop.f32.mrf.mxu3  ;;  %v194_v28 = vadd.f32 %v193_v26, %v124_v8  ;;  %v233_v30 = vadd.f32 %v230_v25, %v229_v22 }
  0xb8   :  { %v221_v29 = vmax.f32 %v171_v24, 0.0 }
  0xb9   :  { %v217_v31 = vadd.f32 %v216_v27, %v194_v28  ;;  %234 = vadd.xlane.f32.xlu0 %v233_v30 }
  0xba   :  { %v231_v32 = vmul.f32 %v225_v16, %v221_v29 }
  0xbb   :  { %v222_v33 = vmax.f32 %v217_v31, 0.0 }
  0xbd   :  { %v232_v34 = vmul.f32 %v226_v18, %v222_v33 }
  0xbf   :  { %v236_v35 = vadd.f32 %v232_v34, %v231_v32 }
  0xc1   :  { %237 = vadd.xlane.f32.xlu0 %v236_v35 }
 0x12c   :  { %v235_v37 = vpop.xlane.xlu0 %234 }
 0x12d   :  { %v241_v38 = vadd.f32 %v240_v36, %v235_v37 }
 0x12f   :  { %v290_v39 = vmul.f32 -1.442695, %v241_v38 }
 0x131   :  { %296 = vpow2.f32 %v290_v39 }
 0x134   :  { %v238_v40 = vpop.xlane.xlu0 %237 }
 0x135   :  { %v242_v41 = vadd.f32 %v240_v36, %v238_v40 }
 0x137   :  { %v297_v42 = vpop.eup %296  ;;  %v291_v43 = vmul.f32 -1.442695, %v242_v41 }
 0x138   :  { %v249_v44 = vadd.f32 1.0, %v297_v42 }
 0x139   :  { %298 = vpow2.f32 %v291_v43 }
 0x13a   :  { %300 = vrcp.f32 %v249_v44  ;;  %v262_v50 = vand.u32 2147483648, %v249_v44  ;;  %v260_v52 = vand.u32 2147483647, %v249_v44  ;;  %vm256_vm1 = vweird.f32 %v249_v44 }
 0x13c   :  { %v263_v55 = vor.u32 1.1754944e-38, %v262_v50  ;;  %vm261_vm4 = vcmp.eq.f32.partialorder %v260_v52, 8.507059e+37 }
 0x13f   :  { %v299_v45 = vpop.eup %298 }
 0x140   :  { %v301_v46 = vpop.eup %300  ;;  %v250_v47 = vadd.f32 1.0, %v299_v45 }
 0x141   :  { %v252_v48 = vmul.f32 %v301_v46, %v249_v44  ;;  %vm257_vm0 = vweird.f32 %v301_v46 }
 0x142   :  { %302 = vrcp.f32 %v250_v47  ;;  %vm258_vm3 = vmor %vm256_vm1, %vm257_vm0  ;;  %v277_v60 = vand.u32 2147483648, %v250_v47  ;;  %v275_v62 = vand.u32 2147483647, %v250_v47  ;;  %vm271_vm6 = vweird.f32 %v250_v47 }
 0x143   :  { %v253_v49 = vsub.f32 1.0, %v252_v48 }
 0x144   :  { %v278_v0 = vor.u32 1.1754944e-38, %v277_v60  ;;  %vm276_vm8 = vcmp.eq.f32.partialorder %v275_v62, 8.507059e+37 }
 0x145   :  { %v254_v51 = vmul.f32 %v301_v46, %v253_v49 }
 0x147   :  { %v255_v53 = vadd.f32 %v301_v46, %v254_v51 }
 0x148   :  { %v303_v54 = vpop.eup %302 }
 0x149   :  { %v259_v56 = vsel %vm258_vm3, %v301_v46, %v255_v53  ;;  %v267_v57 = vmul.f32 %v303_v54, %v250_v47  ;;  %vm272_vm5 = vweird.f32 %v303_v54 }
 0x14a   :  { %v264_v58 = vsel %vm261_vm4, %v263_v55, %v259_v56  ;;  %vm273_vm7 = vmor %vm271_vm6, %vm272_vm5 }
 0x14b   :  { %282 = vst.msk [vmem:[%s418_s5] sm:$0xff] %vm281_vm2, %v264_v58  ;;  %v268_v59 = vsub.f32 1.0, %v267_v57 }
 0x14d   :  { %v269_v61 = vmul.f32 %v303_v54, %v268_v59 }
 0x14f   :  { %v270_v63 = vadd.f32 %v303_v54, %v269_v61 }
 0x151   :  { %v274_v1 = vsel %vm273_vm7, %v303_v54, %v270_v63 }
 0x152   :  { %v279_v2 = vsel %vm276_vm8, %v278_v0, %v274_v1 }
 0x153   :  { %283 = vst.msk [vmem:[%s418_s5 + $0x8] sm:$0xff] %vm281_vm2, %v279_v2 }
 0x154   :  { %288 = vsyncpa [#allocation4], 1 }
 0x155   :  { %289 = vsyncpa [#allocation6], 1 }

</bundles_post_ra>
